<compile_context>
chip_gen: v6e
topology: v6e:2x2x1
jax: 0.10.0
libtpu: 0.0.40
codegen_flags: <defaults>
</compile_context>

<pallas_src>
import jax
import jax.numpy as jnp
from jax.experimental import pallas as pl
from jax.experimental.pallas import tpu as pltpu

EPS = 1e-5
LANE = 128


def _round_up(x, m):
    return ((x + m - 1) // m) * m


# ----------------------------- Pallas kernels -------------------------------
def gemm_bias_relu_kernel(x_ref, w_ref, b_ref, o_ref):
    # 1x1 conv as GEMM (BN scale pre-folded into w) + bias + ReLU.
    y = jnp.dot(x_ref[...], w_ref[...], preferred_element_type=jnp.float32)
    y = y + b_ref[...]
    o_ref[...] = jnp.maximum(y, 0.0).astype(o_ref.dtype)


def gemm_bias_res_relu_kernel(x_ref, w_ref, b_ref, res_ref, o_ref):
    # Final stage: 1x1 conv as GEMM + bias + residual add + ReLU.
    y = jnp.dot(x_ref[...], w_ref[...], preferred_element_type=jnp.float32)
    y = y + b_ref[...] + res_ref[...]
    o_ref[...] = jnp.maximum(y, 0.0).astype(o_ref.dtype)


def conv3x3_bias_relu_kernel(x_ref, w_ref, b_ref, o_ref):
    # Direct 3x3 conv (pad=1, stride=1) on one haloed image tile:
    # 9 shifted (H*W, Cin) x (Cin, Cout) MXU dots accumulated in f32.
    _, HP, WP, _ = x_ref.shape
    H, W = HP - 2, WP - 2
    cout = o_ref.shape[-1]
    x = x_ref[0]                                   # (H+2, W+2, Cin_p) bf16
    acc = jnp.zeros((H * W, cout), jnp.float32)
    for dy in range(3):                            # statically unrolled
        for dx in range(3):
            patch = x[dy:dy + H, dx:dx + W, :].reshape(H * W, -1)
            acc = acc + jnp.dot(patch, w_ref[dy, dx],
                                preferred_element_type=jnp.float32)
    y = acc + b_ref[...]
    o_ref[0] = jnp.maximum(y, 0.0).reshape(H, W, cout).astype(o_ref.dtype)


# --------------------------- pallas_call wrappers ----------------------------
def conv1x1_fused(x2d, w2d, bias, residual=None, *, out_dtype, tile_m):
    """x2d: (Mp, Kp) bf16, w2d: (Kp, Cp) bf16, bias: (1, Cp) f32,
    residual: optional (Mp, Cp) f32. Returns (Mp, Cp) out_dtype."""
    Mp, Kp = x2d.shape
    Cp = w2d.shape[1]
    grid = (Mp // tile_m,)

    in_specs = [
        pl.BlockSpec((tile_m, Kp), lambda i: (i, 0)),    # activation tile
        pl.BlockSpec((Kp, Cp), lambda i: (0, 0)),        # BN-folded weights
        pl.BlockSpec((1, Cp), lambda i: (0, 0)),         # BN bias
    ]
    args = [x2d, w2d, bias]
    if residual is None:
        kernel = gemm_bias_relu_kernel
    else:
        kernel = gemm_bias_res_relu_kernel
        in_specs.append(pl.BlockSpec((tile_m, Cp), lambda i: (i, 0)))
        args.append(residual)

    return pl.pallas_call(
        kernel,
        out_shape=jax.ShapeDtypeStruct((Mp, Cp), out_dtype),
        grid_spec=pltpu.PrefetchScalarGridSpec(
            num_scalar_prefetch=0,
            grid=grid,
            in_specs=in_specs,
            out_specs=pl.BlockSpec((tile_m, Cp), lambda i: (i, 0)),
        ),
        compiler_params=pltpu.CompilerParams(
            dimension_semantics=("parallel",)),
    )(*args)


def conv3x3_fused(x_haloed, w4d, bias, *, out_dtype):
    """x_haloed: (N, H+2, W+2, Cin_p) bf16, w4d: (3, 3, Cin_p, Cout_p) bf16,
    bias: (1, Cout_p) f32. Returns (N, H, W, Cout_p) out_dtype."""
    N, HP, WP, Cin_p = x_haloed.shape
    H, W = HP - 2, WP - 2
    Cout_p = w4d.shape[-1]
    return pl.pallas_call(
        conv3x3_bias_relu_kernel,
        out_shape=jax.ShapeDtypeStruct((N, H, W, Cout_p), out_dtype),
        grid_spec=pltpu.PrefetchScalarGridSpec(
            num_scalar_prefetch=0,
            grid=(N,),
            in_specs=[
                pl.BlockSpec((1, HP, WP, Cin_p), lambda n: (n, 0, 0, 0)),
                pl.BlockSpec((3, 3, Cin_p, Cout_p), lambda n: (0, 0, 0, 0)),
                pl.BlockSpec((1, Cout_p), lambda n: (0, 0)),
            ],
            out_specs=pl.BlockSpec((1, H, W, Cout_p), lambda n: (n, 0, 0, 0)),
        ),
        compiler_params=pltpu.CompilerParams(
            dimension_semantics=("parallel",)),
    )(x_haloed, w4d, bias)


# ------------------------------- JAX glue ------------------------------------
def bn_fold(gamma, beta, mean, var):
    scale = gamma / jnp.sqrt(var + EPS)
    bias = beta - mean * scale
    return scale, bias


def bottleneck_forward(x_nchw, params, *, tile_m=256):
    """Bottleneck forward (stride=1, downsample=None), NCHW I/O like PyTorch."""
    (w1, g1, b1, m1, v1,
     w2, g2, b2, m2, v2,
     w3, g3, b3, m3, v3) = params

    x = jnp.transpose(x_nchw, (0, 2, 3, 1)).astype(jnp.float32)   # NHWC
    N, H, W, Cin = x.shape
    planes = w1.shape[0]
    Cout = w3.shape[0]                       # planes * expansion (== Cin here)
    M = N * H * W

    Cin_p = _round_up(Cin, LANE)
    Cmid_p = _round_up(planes, LANE)
    Cout_p = _round_up(Cout, LANE)
    tm = min(tile_m, _round_up(M, 8))
    Mp = _round_up(M, tm)

    # Fold BN scale into conv weights; keep only a per-channel bias.
    s1, bb1 = bn_fold(g1, b1, m1, v1)
    s2, bb2 = bn_fold(g2, b2, m2, v2)
    s3, bb3 = bn_fold(g3, b3, m3, v3)

    w1_2d = jnp.transpose(w1[:, :, 0, 0], (1, 0)) * s1[None, :]          # (Cin, planes)
    w1_p = jnp.zeros((Cin_p, Cmid_p), jnp.float32).at[:Cin, :planes].set(w1_2d)
    b1_p = jnp.zeros((1, Cmid_p), jnp.float32).at[0, :planes].set(bb1)

    w2_4d = jnp.transpose(w2, (2, 3, 1, 0)) * s2[None, None, None, :]    # (3,3,planes,planes)
    w2_p = jnp.zeros((3, 3, Cmid_p, Cmid_p), jnp.float32)
    w2_p = w2_p.at[:, :, :planes, :planes].set(w2_4d)
    b2_p = jnp.zeros((1, Cmid_p), jnp.float32).at[0, :planes].set(bb2)

    w3_2d = jnp.transpose(w3[:, :, 0, 0], (1, 0)) * s3[None, :]          # (planes, Cout)
    w3_p = jnp.zeros((Cmid_p, Cout_p), jnp.float32).at[:planes, :Cout].set(w3_2d)
    b3_p = jnp.zeros((1, Cout_p), jnp.float32).at[0, :Cout].set(bb3)

    # ---- stage 1: conv1x1 + bn1 + relu (no residual stream) ----
    x2d = x.reshape(M, Cin)
    x2d_p = jnp.zeros((Mp, Cin_p), jnp.bfloat16).at[:M, :Cin].set(
        x2d.astype(jnp.bfloat16))
    out1 = conv1x1_fused(x2d_p, w1_p.astype(jnp.bfloat16), b1_p,
                         out_dtype=jnp.bfloat16, tile_m=tm)       # (Mp, Cmid_p)

    # ---- stage 2: conv3x3 + bn2 + relu (halo tile in-kernel, no im2col) ----
    out1_img = out1[:M].reshape(N, H, W, Cmid_p)
    out1_halo = jnp.pad(out1_img, ((0, 0), (1, 1), (1, 1), (0, 0)))
    out2 = conv3x3_fused(out1_halo, w2_p.astype(jnp.bfloat16), b2_p,
                         out_dtype=jnp.bfloat16)                  # (N, H, W, Cmid_p)

    # ---- stage 3: conv1x1 + bn3 + residual + relu ----
    x3_p = jnp.zeros((Mp, Cmid_p), jnp.bfloat16).at[:M].set(
        out2.reshape(M, Cmid_p))
    res_p = jnp.zeros((Mp, Cout_p), jnp.float32).at[:M, :Cin].set(x2d)
    out3 = conv1x1_fused(x3_p, w3_p.astype(jnp.bfloat16), b3_p,
                         residual=res_p, out_dtype=jnp.float32, tile_m=tm)

    out = out3[:M, :Cout].reshape(N, H, W, Cout)
    return jnp.transpose(out, (0, 3, 1, 2))                       # NCHW


# ------------------------------ pure-JAX ref ---------------------------------
def ref_forward(x_nchw, params):
    (w1, g1, b1, m1, v1,
     w2, g2, b2, m2, v2,
     w3, g3, b3, m3, v3) = params

    def conv(x, w, pad):
        return jax.lax.conv_general_dilated(
            x, w, (1, 1), ((pad, pad), (pad, pad)),
            dimension_numbers=("NCHW", "OIHW", "NCHW"))

    def bn(x, g, b, m, v):
        sh = (1, -1, 1, 1)
        return (x - m.reshape(sh)) * (g / jnp.sqrt(v + EPS)).reshape(sh) + b.reshape(sh)

    out = jax.nn.relu(bn(conv(x_nchw, w1, 0), g1, b1, m1, v1))
    out = jax.nn.relu(bn(conv(out, w2, 1), g2, b2, m2, v2))
    out = bn(conv(out, w3, 0), g3, b3, m3, v3)
    return jax.nn.relu(out + x_nchw)


# --------------------------------- main --------------------------------------
if __name__ == "__main__":
    N, C, H, W = 2, 8, 16, 16          # inplanes == planes, stride=1, downsample=None
    planes = C
    key = jax.random.PRNGKey(0)
    kx, k1, k2, k3 = jax.random.split(key, 4)

    x = jax.random.normal(kx, (N, C, H, W), dtype=jnp.float32)

    w1 = 0.1 * jax.random.normal(k1, (planes, C, 1, 1), dtype=jnp.float32)
    w2 = 0.1 * jax.random.normal(k2, (planes, planes, 3, 3), dtype=jnp.float32)
    w3 = 0.1 * jax.random.normal(k3, (planes, planes, 1, 1), dtype=jnp.float32)

    def bn_params(i, c):
        a = jnp.arange(c, dtype=jnp.float32) / c
        return (1.0 + 0.05 * i * a,    # gamma
                0.02 * i * a,          # beta
                0.01 * i * a,          # running_mean
                1.0 + 0.03 * i * a)    # running_var

    g1, b1, m1, v1 = bn_params(1, planes)
    g2, b2, m2, v2 = bn_params(2, planes)
    g3, b3, m3, v3 = bn_params(3, planes)

    params = (w1, g1, b1, m1, v1,
              w2, g2, b2, m2, v2,
              w3, g3, b3, m3, v3)

    out = jax.block_until_ready(bottleneck_forward(x, params))
    ref = jax.block_until_ready(ref_forward(x, params))

    assert out.shape == (N, C, H, W)
    max_err = float(jnp.max(jnp.abs(out - ref)))
    # bf16 matmul operands with f32 accumulation -> loosened tolerance.
    assert jnp.allclose(out, ref, atol=3e-2, rtol=3e-2), \
        f"Pallas output mismatch vs reference (max abs err={max_err})"
    print("KERNEL_OK")
</pallas_src>

<mosaic_0001>
module attributes {stable_mosaic.version = 11 : i64} {
  func.func @gemm_bias_relu_kernel(%arg0: i32, %arg1: memref<256x128xbf16, #tpu.memory_space<vmem>>, %arg2: memref<128x128xbf16, #tpu.memory_space<vmem>>, %arg3: memref<1x128xf32, #tpu.memory_space<vmem>>, %arg4: memref<256x128xbf16, #tpu.memory_space<vmem>>) attributes {dimension_semantics = [#tpu.dimension_semantics<parallel>], iteration_bounds = array<i64: 2>, scalar_prefetch = 0 : i64, scratch_operands = 0 : i64, tpu.core_type = #tpu.core_type<tc>, window_params = [{transform_indices = @transform_0, window_bounds = array<i64: 256, 128>}, {pipeline_mode = #tpu.pipeline_mode<synchronous>, transform_indices = @transform_1, window_bounds = array<i64: 128, 128>}, {pipeline_mode = #tpu.pipeline_mode<synchronous>, transform_indices = @transform_2, window_bounds = array<i64: 1, 128>}, {transform_indices = @transform_3, window_bounds = array<i64: 256, 128>}]} {
    %c0 = arith.constant 0 : index
    %c0_0 = arith.constant 0 : index
    %0 = vector.load %arg1[%c0, %c0_0] : memref<256x128xbf16, #tpu.memory_space<vmem>>, vector<256x128xbf16>
    %c0_1 = arith.constant 0 : index
    %c0_2 = arith.constant 0 : index
    %1 = vector.load %arg2[%c0_1, %c0_2] : memref<128x128xbf16, #tpu.memory_space<vmem>>, vector<128x128xbf16>
    %cst = arith.constant dense<0.000000e+00> : vector<256x128xf32>
    %2 = tpu.matmul %0, %1, %cst {dimension_numbers = #tpu.dot_dimension_numbers<[1], [0], [0], [1], [0, 0, 1, 1], [], []>} : vector<256x128xbf16>, vector<128x128xbf16>, vector<256x128xf32> -> vector<256x128xf32>
    %c0_3 = arith.constant 0 : index
    %c0_4 = arith.constant 0 : index
    %3 = vector.load %arg3[%c0_3, %c0_4] : memref<1x128xf32, #tpu.memory_space<vmem>>, vector<1x128xf32>
    %4 = vector.broadcast %3 : vector<1x128xf32> to vector<256x128xf32>
    %5 = arith.addf %2, %4 : vector<256x128xf32>
    %cst_5 = arith.constant 0.000000e+00 : f32
    %6 = vector.broadcast %cst_5 : f32 to vector<256x128xf32>
    %7 = arith.maximumf %5, %6 : vector<256x128xf32>
    %8 = arith.truncf %7 : vector<256x128xf32> to vector<256x128xbf16>
    %c0_6 = arith.constant 0 : index
    %c0_7 = arith.constant 0 : index
    %9 = vector.load %arg4[%c0_6, %c0_7] : memref<256x128xbf16, #tpu.memory_space<vmem>>, vector<256x128xbf16>
    tpu.vector_store %arg4[%c0_6, %c0_7], %8 {strides = array<i32>} : memref<256x128xbf16, #tpu.memory_space<vmem>>, vector<256x128xbf16>,
    return
  }
  func.func @transform_0(%arg0: i32) -> (i32, i32) {
    %c0_i32 = arith.constant 0 : i32
    %c0_i32_0 = arith.constant 0 : i32
    return %arg0, %c0_i32 : i32, i32
  }
  func.func @transform_1(%arg0: i32) -> (i32, i32) {
    %c0_i32 = arith.constant 0 : i32
    %c0_i32_0 = arith.constant 0 : i32
    %c0_i32_1 = arith.constant 0 : i32
    return %c0_i32, %c0_i32_0 : i32, i32
  }
  func.func @transform_2(%arg0: i32) -> (i32, i32) {
    %c0_i32 = arith.constant 0 : i32
    %c0_i32_0 = arith.constant 0 : i32
    %c0_i32_1 = arith.constant 0 : i32
    return %c0_i32, %c0_i32_0 : i32, i32
  }
  func.func @transform_3(%arg0: i32) -> (i32, i32) {
    %c0_i32 = arith.constant 0 : i32
    %c0_i32_0 = arith.constant 0 : i32
    return %arg0, %c0_i32 : i32, i32
  }
}

</mosaic_0001>

<bundles_post_ra>
// kernel: tpu_custom_call.1
= control target key start
LH: loop header
LB: loop body
LE: loop exit
PB: predicated region body
PF: predicated region fallthrough
CT: control target
= control target key end

     0   :  { %8 = vsyncpa [#allocation3], 0  ;;  %s1643_s0 = inlined_call_operand.hbm [shape: bf16[512,128], index: 0, kind: input, shape index: {}]   ;;  %s1644_s1 = inlined_call_operand.hbm [shape: bf16[128,128], index: 1, kind: input, shape index: {}]   ;;  %s1645_s2 = inlined_call_operand.vmem [shape: f32[1,128], index: 2, kind: input, shape index: {}]   ;;  %s1646_s3 = inlined_call_operand.hbm [shape: bf16[512,128], index: 3, kind: output, shape index: {}]  }
   0x1   :  { %10 = vsyncpa [#allocation3 + $0x1], 0 }
   0x2   :  { %11 = vsyncpa [#allocation6], 0 }
   0x3   :  { %12 = vsyncpa [#allocation4], 0 }
   0x4   :  { %14 = vsyncpa [#allocation4 + $0x1], 0  ;;  %s1382_s12 = smov 0   ;;  %s1384_s13 = smov 0  }
   0x5   :  { %s1386_s14 = smov 0   ;;  %s1388_s15 = smov 0  }
   0x6 LB: > { %s1403_s16 = sadd.s32 4294967295, %s1353_s15   ;;  %s856_s17 = sadd.s32 4294967294, %s1353_s15   ;;  %s1353_s15 = sphi %s1388_s15, %s1668_s15   ;;  %s1349_s14 = sphi %s1386_s14, %s1667_s14   ;;  %s1345_s13 = sphi %s1384_s13, %s1666_s13   ;;  %s1341_s12 = sphi %s1382_s12, %s1665_s12  }
   0x7   : > { %p40_p0 = scmp.ne.s32.totalorder %s1345_s13, %s1341_s12  ;;  %p1647_p1 = scmp.eq.s32.totalorder %s1403_s16, 0 }
   0x8   : > { %p112_p3 = scmp.eq.s32.totalorder %s856_s17, 1  ;;  %p857_p5 = scmp.ge.s32.totalorder %s1353_s15, 1 }
   0x9   : > { %p1412_p4 = por %p1647_p1, %p40_p0  ;;  %p119_p7 = scmp.lt.s32.totalorder %s1353_s15, 3 }
   0xa   : > { %p1417_p6 = por %p112_p3, %p40_p0  ;;  %s1355_s21 = smov [#allocation5]  }
   0xb   : > { %s1651_s18 = scalar_select %p1412_p4, 1, 0 }
   0xc   : > { %s1652_s19 = scalar_select %p1417_p6, 1, 0 }
   0xd   : > { %p1422_p8 = pnand %p857_p5, %p119_p7  ;;  %s131_s22 = sshll.u32 %s1355_s21, 4  ;;  %s132_s22 = int_to_ptr.vmem [resolvable:$true] %s131_s22 }
   0xe   : > { %s1436_s24 = sadd.s32 1, %s1353_s15   ;;  %s27_s25 = sadd.s32 1, %s1349_s14 }
   0xf   : > { %s1653_s20 = scalar_select %p1422_p8, 1, 0 }
  0x10   : > { %p1154_p9 = pneg %p1422_p8  ;;  %s24_s26 = ssub.s32 %s1353_s15, %s1436_s24 }
  0x11   : > { %s1242_s27 = scalar_lea.vmem %s132_s22, 1024  ;;  %p1250_p5 = scmp.lt.s32.totalorder %s132_s22, %s132_s22 }
  0x12   : > { %p1431_p11 = pnand %p1154_p9, %p1647_p1  ;;  %p1243_p13 = scmp.ne.s32.totalorder %s132_s22, %s1242_s27 }
  0x13   : > { %p1251_p7 = scmp.lt.s32.totalorder %s1242_s27, %s1242_s27 }
  0x14   : > { %p1233_p12 = pneg %p1431_p11 }
  0x15   : > { %p1252_p10 = por %p1251_p7, %p1250_p5 }
  0x16   : > { %p1245_p0 = pnand %p1243_p13, %p1233_p12 }
  0x18   : > { %p1246_p3 = pneg %p1245_p0 }
  0x1a   : > { %p1253_p2 = pnand %p1252_p10, %p1246_p3 }
  0x1c   : > { %1256 = shalt.err (!%p1253_p2)
}
  0x1d   : > { %s1356_s28 = smov 64   ;;  %s1357_s29 = smov 4  }
  0x1e   : > { %1157 = dma.hbm_to_vmem [thread:$0]  (!%p1431_p11), %s1644_s1, 1024, %s132_s22, [#allocation6], %s1356_s28, %s1356_s28, %s1357_s29  }
  0x1f   : > { %p25_p2 = scmp.eq.s32.totalorder %s24_s26, 0  ;;  %p34_p9 = scmp.ne.s32.totalorder %s1349_s14, %s1345_s13 }
  0x20   : > { %p35_p10 = scmp.eq.s32.totalorder %s1353_s15, 0  ;;  %p1167_p12 = scmp.lt.s32.totalorder %s1353_s15, 2 }
  0x21   : > { %s1456_s5 = scalar_select %p25_p2, %s1349_s14, %s27_s25  }
  0x22   : > { %p36_p13 = por %p35_p10, %p34_p9  ;;  %p1655_p0 = scmp.eq.s32.totalorder %s1403_s16, 1 }
  0x23   : > { %s148_s7 = sand.u32 1, %s1349_s14   ;;  %s929_s8 = sshll.u32 %s1353_s15, 11 }
  0x24   : > { %p1460_p3 = por %p1655_p0, %p34_p9  ;;  %s860_s9 = sshll.u32 %s148_s7, 7 }
  0x25   : > { %s1469_s17 = scalar_lea.hbm %s1643_s0, %s929_s8  ;;  %s152_s21 = scalar_lea.vmem [#allocation2], %s860_s9 }
  0x26   : > { %s1656_s6 = scalar_select %p1460_p3, 1, 0 }
  0x27   : > { %s159_s22 = sshll.u32 %s152_s21, 4  ;;  %p1471_p11 = pnand %p1167_p12, %p36_p13  ;;  %s1475_s22 = int_to_ptr.vmem [resolvable:$true] %s159_s22 }
  0x28   : > { %s1477_s25 = scalar_lea.sflag [#allocation3], %s148_s7  ;;  %s1257_s26 = scalar_lea.hbm %s1469_s17, 2048 }
  0x29   : > { %p1258_p5 = scmp.ne.s32.totalorder %s1469_s17, %s1257_s26  ;;  %p1259_p7 = pneg %p1471_p11 }
  0x2a   : > { %s1262_s4 = scalar_lea.hbm %s1643_s0, 4096  ;;  %p1263_p10 = scmp.lt.s32.totalorder %s1469_s17, %s1643_s0 }
  0x2b   : > { %p1260_p2 = pnand %p1259_p7, %p1258_p5  ;;  %p1264_p12 = scmp.lt.s32.totalorder %s1262_s4, %s1257_s26 }
  0x2d   : > { %p1261_p9 = pneg %p1260_p2  ;;  %p1265_p13 = por %p1264_p12, %p1263_p10 }
  0x2f   : > { %p1266_p0 = pnand %p1265_p13, %p1261_p9 }
  0x31   : > { %1269 = shalt.err (!%p1266_p0)
}
  0x32   : > { %s1270_s7 = scalar_lea.vmem %s1475_s22, 2048  ;;  %s1358_s10 = smov [#allocation2]  }
  0x33   : > { %p1271_p1 = scmp.ne.s32.totalorder %s1475_s22, %s1270_s7  ;;  %s1275_s11 = sshll.u32 %s1358_s10, 4  ;;  %s1276_s11 = int_to_ptr.vmem [resolvable:$false] %s1275_s11 }
  0x34   : > { %s1277_s21 = scalar_lea.vmem %s1276_s11, 4096  ;;  %p1278_p2 = scmp.lt.s32.totalorder %s1475_s22, %s1276_s11 }
  0x35   : > { %p1273_p6 = pnand %p1271_p1, %p1259_p7  ;;  %p1279_p3 = scmp.lt.s32.totalorder %s1277_s21, %s1270_s7 }
  0x37   : > { %p1274_p5 = pneg %p1273_p6  ;;  %p1280_p4 = por %p1279_p3, %p1278_p2 }
  0x39   : > { %p1281_p8 = pnand %p1280_p4, %p1274_p5 }
  0x3b   : > { %1284 = shalt.err (!%p1281_p8)
}
  0x3c   : > { %1161 = dma.hbm_to_vmem [thread:$0]  (!%p1471_p11), %s1469_s17, 2048, %s1475_s22, %s1477_s25, %s1356_s28, %s1356_s28, %s1357_s29  }
  0x3d   : > { %p1658_p1 = scmp.ne.s32.totalorder %s1653_s20, 0 }
  0x3e   : > { %s1504_s26 = sand.u32 (!%p1658_p1), 1, %s1345_s13   ;;  %p1659_p4 = scmp.ne.s32.totalorder (!%p1658_p1), %s1651_s18, 0 }
  0x3f   : > { %171 = sbr.rel (%p1658_p1) target bundleno = 348 (0x15c), region = 32  ;;  %s864_s27 = sshll.u32 (!%p1658_p1), %s1504_s26, 7 }
  0x40   : > { %s174_s30 = scalar_lea.sflag (!%p1658_p1), [#allocation3], %s1504_s26  ;;  %s1510_s23 = scalar_lea.vmem (!%p1658_p1), [#allocation2], %s864_s27 }
  0x44   : > { %1328 = dma.done.wait (%p1659_p4), %s174_s30, 2048  }
  0x45   : > { %1330 = vsyncadd (%p1659_p4), %s174_s30, 4294965248  ;;  %p1660_p6 = scmp.eq.s32.totalorder %s1403_s16, 0 }
  0x47   : > { %1332 = dma.done.wait (%p1660_p6), [#allocation6], 1024   ;;  %p1661_p8 = pmov %p1660_p6 }
  0x48   : > { %v1207_v0 = vld [vmem:[#allocation5 + $0x38] sm:$0xff]   ;;  %v1208_v1 = vld [vmem:[#allocation5 + $0x30] sm:$0xff]   ;;  %v1209_v2 = vld [vmem:[#allocation5 + $0x28] sm:$0xff]   ;;  %s1553_s28 = scalar_lea.vmem [#allocation7], %s864_s27  ;;  %s962_s29 = sshll.u32 %s1403_s16, 11 }
  0x49   : > { %1334 = vsyncadd (%p1661_p8), [#allocation6], 4294966272  ;;  %1082 = vmatprep.subr.bf16.mxu0 %v1207_v0  ;;  %1130 = vmatprep.subr.bf16.mxu1 %v1207_v0  ;;  %v1210_v3 = vld [vmem:[#allocation5 + $0x20] sm:$0xff]   ;;  %v1211_v6 = vld [vmem:[#allocation5 + $0x18] sm:$0xff]   ;;  %s773_s17 = sshll.u32 %s1553_s28, 4  ;;  %s1594_s4 = scalar_lea.hbm %s1646_s3, %s962_s29  ;;  %s1596_s17 = int_to_ptr.vmem [resolvable:$true] %s773_s17 }
  0x4a   : > { %1083 = vmatpush3.bf16.msra.mxu0 %v1207_v0  ;;  %1138 = vmatpush3.bf16.msra.mxu1 %v1207_v0  ;;  %v1215_v4 = vld [vmem:[%s1510_s23] sm:$0xff]   ;;  %v1212_v7 = vld [vmem:[#allocation5 + $0x10] sm:$0xff]   ;;  %v1213_v8 = vld [vmem:[#allocation5 + $0x8] sm:$0xff]   ;;  %s760_s16 = scalar_lea.sflag [#allocation4], %s1504_s26  ;;  %s1285_s8 = scalar_lea.vmem %s1596_s17, 2048 }
  0x4b   : > { %1084 = vmatprep.subr.bf16.mxu0 %v1208_v1  ;;  %1131 = vmatprep.subr.bf16.mxu1 %v1208_v1  ;;  %v1216_v5 = vld [vmem:[%s1510_s23 + $0x40] sm:$0xff]   ;;  %v1217_v10 = vld [vmem:[%s1510_s23 + $0x8] sm:$0xff]   ;;  %v1219_v12 = vld [vmem:[%s1510_s23 + $0x10] sm:$0xff]   ;;  %p1286_p3 = scmp.ne.s32.totalorder %s1596_s17, %s1285_s8  ;;  %p1662_p11 = scmp.ne.s32.totalorder %s1656_s6, 0 }
  0x4c   : > { %1098 = vmatprep.mubr.bf16.mxu0 %v1215_v4  ;;  %1114 = vmatprep.mubr.bf16.mxu1 %v1216_v5  ;;  %v1214_v9 = vld [vmem:[#allocation5] sm:$0xff]   ;;  %v1218_v11 = vld [vmem:[%s1510_s23 + $0x48] sm:$0xff]   ;;  %v1220_v13 = vld [vmem:[%s1510_s23 + $0x50] sm:$0xff]   ;;  %s1359_s9 = smov [#allocation7]  }
  0x4d   : > { %v1221_v14 = vld [vmem:[%s1510_s23 + $0x18] sm:$0xff]   ;;  %v1223_v16 = vld [vmem:[%s1510_s23 + $0x20] sm:$0xff]   ;;  %v1225_v18 = vld [vmem:[%s1510_s23 + $0x28] sm:$0xff]   ;;  %p1287_p7 = pnand %p1286_p3, %p1662_p11  ;;  %s1289_s7 = sshll.u32 %s1359_s9, 4  ;;  %s1290_s7 = int_to_ptr.vmem [resolvable:$false] %s1289_s7 }
  0x4e   : > { %1085 = vmatpush3.bf16.msra.mxu0 %v1208_v1  ;;  %1139 = vmatpush3.bf16.msra.mxu1 %v1208_v1  ;;  %v1222_v15 = vld [vmem:[%s1510_s23 + $0x58] sm:$0xff]   ;;  %v1224_v17 = vld [vmem:[%s1510_s23 + $0x60] sm:$0xff]   ;;  %v1226_v19 = vld [vmem:[%s1510_s23 + $0x68] sm:$0xff]   ;;  %s1291_s10 = scalar_lea.vmem %s1290_s7, 4096  ;;  %p1292_p10 = scmp.lt.s32.totalorder %s1596_s17, %s1290_s7 }
  0x4f   : > { %1086 = vmatprep.subr.bf16.mxu0 %v1209_v2  ;;  %1132 = vmatprep.subr.bf16.mxu1 %v1209_v2  ;;  %v1227_v20 = vld [vmem:[%s1510_s23 + $0x30] sm:$0xff]   ;;  %v1229_v22 = vld [vmem:[%s1510_s23 + $0x38] sm:$0xff]   ;;  %v1539_v24 = vld [vmem:[%s1645_s2] ss:$0 sm:$0xff]  ;;  %p1288_p9 = pneg %p1287_p7  ;;  %p1293_p12 = scmp.lt.s32.totalorder %s1291_s10, %s1285_s8 }
  0x50   : > { %v1228_v21 = vld [vmem:[%s1510_s23 + $0x70] sm:$0xff]   ;;  %v1230_v23 = vld [vmem:[%s1510_s23 + $0x78] sm:$0xff]  }
  0x51   : > { %p1294_p13 = por %p1293_p12, %p1292_p10 }
  0x52   : > { %1087 = vmatpush3.bf16.msra.mxu0 %v1209_v2  ;;  %1140 = vmatpush3.bf16.msra.mxu1 %v1209_v2 }
  0x53   : > { %1088 = vmatprep.subr.bf16.mxu0 %v1210_v3  ;;  %1133 = vmatprep.subr.bf16.mxu1 %v1210_v3  ;;  %p1295_p0 = pnand %p1294_p13, %p1288_p9 }
  0x56   : > { %1089 = vmatpush3.bf16.msra.mxu0 %v1210_v3  ;;  %1141 = vmatpush3.bf16.msra.mxu1 %v1210_v3 }
  0x57   : > { %1090 = vmatprep.subr.bf16.mxu0 %v1211_v6  ;;  %1134 = vmatprep.subr.bf16.mxu1 %v1211_v6 }
  0x5a   : > { %1091 = vmatpush3.bf16.msra.mxu0 %v1211_v6  ;;  %1142 = vmatpush3.bf16.msra.mxu1 %v1211_v6 }
  0x5b   : > { %1092 = vmatprep.subr.bf16.mxu0 %v1212_v7  ;;  %1135 = vmatprep.subr.bf16.mxu1 %v1212_v7 }
  0x5e   : > { %1093 = vmatpush3.bf16.msra.mxu0 %v1212_v7  ;;  %1143 = vmatpush3.bf16.msra.mxu1 %v1212_v7 }
  0x5f   : > { %1094 = vmatprep.subr.bf16.mxu0 %v1213_v8  ;;  %1136 = vmatprep.subr.bf16.mxu1 %v1213_v8 }
  0x62   : > { %1095 = vmatpush3.bf16.msra.mxu0 %v1213_v8  ;;  %1144 = vmatpush3.bf16.msra.mxu1 %v1213_v8 }
  0x63   : > { %1096 = vmatprep.subr.bf16.mxu0 %v1214_v9  ;;  %1137 = vmatprep.subr.bf16.mxu1 %v1214_v9 }
  0x66   : > { %1097 = vmatpush3.bf16.msra.mxu0 %v1214_v9  ;;  %1145 = vmatpush3.bf16.msra.mxu1 %v1214_v9 }
  0x69   : > { %1099 = vmatmul.mubr.bf16.vlgmr.msra.gmra.mxu0 %v1217_v10  ;;  %1115 = vmatmul.mubr.bf16.vlgmr.msra.gmra.mxu1 %v1218_v11 }
  0x6a   : > { %1102 = vmatprep.mubr.bf16.mxu0 %v1219_v12  ;;  %1118 = vmatprep.mubr.bf16.mxu1 %v1220_v13 }
  0x71   : > { %1103 = vmatmul.mubr.bf16.gmra.mxu0 %v1221_v14  ;;  %1119 = vmatmul.mubr.bf16.gmra.mxu1 %v1222_v15 }
  0x72   : > { %1106 = vmatprep.mubr.bf16.mxu0 %v1223_v16  ;;  %1122 = vmatprep.mubr.bf16.mxu1 %v1224_v17 }
  0x79   : > { %1107 = vmatmul.mubr.bf16.gmra.mxu0 %v1225_v18  ;;  %1123 = vmatmul.mubr.bf16.gmra.mxu1 %v1226_v19 }
  0x7a   : > { %1110 = vmatprep.mubr.bf16.mxu0 %v1227_v20  ;;  %1126 = vmatprep.mubr.bf16.mxu1 %v1228_v21 }
  0x81   : > { %1111 = vmatmul.mubr.bf16.gmra.mxu0 %v1229_v22  ;;  %1127 = vmatmul.mubr.bf16.gmra.mxu1 %v1230_v23 }
 0x129   : > { %v1100_v25 = vpop.f32.mrf.mxu0  ;;  %v1116_v26 = vpop.f32.mrf.mxu1 }
 0x12a   : > { %v449_v27 = vadd.f32 %v1100_v25, %v1539_v24  ;;  %v513_v28 = vadd.f32 %v1116_v26, %v1539_v24 }
 0x12b   : > { %v440_v29 = vpop.f32.mrf.mxu0  ;;  %v504_v30 = vpop.f32.mrf.mxu1 }
 0x12c   : > { %v441_v31 = vadd.f32 %v1539_v24, %v440_v29  ;;  %v505_v32 = vadd.f32 %v1539_v24, %v504_v30  ;;  %v569_v37 = vmax.f32 %v449_v27, 0.0  ;;  %v585_v38 = vmax.f32 %v513_v28, 0.0 }
 0x12d   : > { %v1101_v33 = vpop.f32.mrf.mxu0  ;;  %v1117_v34 = vpop.f32.mrf.mxu1 }
 0x12e   : > { %v452_v35 = vadd.f32 %v1101_v33, %v1539_v24  ;;  %v516_v36 = vadd.f32 %v1117_v34, %v1539_v24  ;;  %v567_v45 = vmax.f32 %v441_v31, 0.0  ;;  %v583_v46 = vmax.f32 %v505_v32, 0.0 }
 0x12f   : > { %v443_v39 = vpop.f32.mrf.mxu0  ;;  %v507_v40 = vpop.f32.mrf.mxu1 }
 0x130   : > { %v570_v41 = vmax.f32 %v452_v35, 0.0  ;;  %v586_v42 = vmax.f32 %v516_v36, 0.0  ;;  %v444_v43 = vadd.f32 %v1539_v24, %v443_v39  ;;  %v508_v44 = vadd.f32 %v1539_v24, %v507_v40 }
 0x131   : > { %v1104_v47 = vpop.f32.mrf.mxu0  ;;  %v1120_v48 = vpop.f32.mrf.mxu1 }
 0x132   : > { %v971_v49 = vpack.c.bf16 %v570_v41, %v569_v37  ;;  %v1011_v50 = vpack.c.bf16 %v586_v42, %v585_v38  ;;  %v568_v51 = vmax.f32 %v444_v43, 0.0  ;;  %v584_v52 = vmax.f32 %v508_v44, 0.0 }
 0x133   : > { %v465_v53 = vadd.f32 %v1104_v47, %v1539_v24  ;;  %v529_v54 = vadd.f32 %v1120_v48, %v1539_v24  ;;  %v456_v55 = vpop.f32.mrf.mxu0  ;;  %v520_v56 = vpop.f32.mrf.mxu1 }
 0x134   : > { %1043 = vst [vmem:[%s1553_s28 + $0x8] sm:$0xff] %v971_v49   ;;  %1051 = vst [vmem:[%s1553_s28 + $0x48] sm:$0xff] %v1011_v50   ;;  %v966_v57 = vpack.c.bf16 %v568_v51, %v567_v45  ;;  %v1006_v58 = vpack.c.bf16 %v584_v52, %v583_v46  ;;  %v457_v59 = vadd.f32 %v1539_v24, %v456_v55 }
 0x135   : > { %v521_v60 = vadd.f32 %v1539_v24, %v520_v56  ;;  %v1105_v61 = vpop.f32.mrf.mxu0  ;;  %v1121_v62 = vpop.f32.mrf.mxu1  ;;  %v573_v1 = vmax.f32 %v465_v53, 0.0  ;;  %v589_v2 = vmax.f32 %v529_v54, 0.0 }
 0x136   : > { %967 = vst [vmem:[%s1553_s28] sm:$0xff] %v966_v57   ;;  %1050 = vst [vmem:[%s1553_s28 + $0x40] sm:$0xff] %v1006_v58   ;;  %v468_v63 = vadd.f32 %v1105_v61, %v1539_v24  ;;  %v532_v0 = vadd.f32 %v1121_v62, %v1539_v24  ;;  %v571_v9 = vmax.f32 %v457_v59, 0.0 }
 0x137   : > { %v459_v3 = vpop.f32.mrf.mxu0  ;;  %v523_v4 = vpop.f32.mrf.mxu1  ;;  %v587_v10 = vmax.f32 %v521_v60, 0.0 }
 0x138   : > { %v574_v5 = vmax.f32 %v468_v63, 0.0  ;;  %v590_v6 = vmax.f32 %v532_v0, 0.0  ;;  %v460_v7 = vadd.f32 %v1539_v24, %v459_v3  ;;  %v524_v8 = vadd.f32 %v1539_v24, %v523_v4 }
 0x139   : > { %v1108_v11 = vpop.f32.mrf.mxu0  ;;  %v1124_v12 = vpop.f32.mrf.mxu1 }
 0x13a   : > { %v981_v13 = vpack.c.bf16 %v574_v5, %v573_v1  ;;  %v1021_v14 = vpack.c.bf16 %v590_v6, %v589_v2  ;;  %v572_v15 = vmax.f32 %v460_v7, 0.0  ;;  %v588_v16 = vmax.f32 %v524_v8, 0.0 }
 0x13b   : > { %v481_v17 = vadd.f32 %v1108_v11, %v1539_v24  ;;  %v545_v18 = vadd.f32 %v1124_v12, %v1539_v24  ;;  %v472_v19 = vpop.f32.mrf.mxu0  ;;  %v536_v20 = vpop.f32.mrf.mxu1 }
 0x13c   : > { %1045 = vst [vmem:[%s1553_s28 + $0x18] sm:$0xff] %v981_v13   ;;  %1053 = vst [vmem:[%s1553_s28 + $0x58] sm:$0xff] %v1021_v14   ;;  %v976_v21 = vpack.c.bf16 %v572_v15, %v571_v9  ;;  %v1016_v22 = vpack.c.bf16 %v588_v16, %v587_v10  ;;  %v473_v23 = vadd.f32 %v1539_v24, %v472_v19 }
 0x13d   : > { %v537_v25 = vadd.f32 %v1539_v24, %v536_v20  ;;  %v1109_v26 = vpop.f32.mrf.mxu0  ;;  %v1125_v27 = vpop.f32.mrf.mxu1  ;;  %v577_v30 = vmax.f32 %v481_v17, 0.0  ;;  %v593_v31 = vmax.f32 %v545_v18, 0.0 }
 0x13e   : > { %1044 = vst [vmem:[%s1553_s28 + $0x10] sm:$0xff] %v976_v21   ;;  %1052 = vst [vmem:[%s1553_s28 + $0x50] sm:$0xff] %v1016_v22   ;;  %v484_v28 = vadd.f32 %v1109_v26, %v1539_v24  ;;  %v548_v29 = vadd.f32 %v1125_v27, %v1539_v24  ;;  %v575_v38 = vmax.f32 %v473_v23, 0.0 }
 0x13f   : > { %v475_v32 = vpop.f32.mrf.mxu0  ;;  %v539_v33 = vpop.f32.mrf.mxu1  ;;  %v591_v39 = vmax.f32 %v537_v25, 0.0 }
 0x140   : > { %v578_v34 = vmax.f32 %v484_v28, 0.0  ;;  %v594_v35 = vmax.f32 %v548_v29, 0.0  ;;  %v476_v36 = vadd.f32 %v1539_v24, %v475_v32  ;;  %v540_v37 = vadd.f32 %v1539_v24, %v539_v33 }
 0x141   : > { %v1112_v40 = vpop.f32.mrf.mxu0  ;;  %v1128_v41 = vpop.f32.mrf.mxu1 }
 0x142   : > { %v991_v42 = vpack.c.bf16 %v578_v34, %v577_v30  ;;  %v1031_v43 = vpack.c.bf16 %v594_v35, %v593_v31  ;;  %v576_v44 = vmax.f32 %v476_v36, 0.0  ;;  %v592_v45 = vmax.f32 %v540_v37, 0.0 }
 0x143   : > { %v497_v46 = vadd.f32 %v1112_v40, %v1539_v24  ;;  %v561_v47 = vadd.f32 %v1128_v41, %v1539_v24  ;;  %v488_v48 = vpop.f32.mrf.mxu0  ;;  %v552_v49 = vpop.f32.mrf.mxu1 }
 0x144   : > { %1047 = vst [vmem:[%s1553_s28 + $0x28] sm:$0xff] %v991_v42   ;;  %1055 = vst [vmem:[%s1553_s28 + $0x68] sm:$0xff] %v1031_v43   ;;  %v986_v50 = vpack.c.bf16 %v576_v44, %v575_v38  ;;  %v1026_v51 = vpack.c.bf16 %v592_v45, %v591_v39  ;;  %v489_v52 = vadd.f32 %v1539_v24, %v488_v48 }
 0x145   : > { %v553_v53 = vadd.f32 %v1539_v24, %v552_v49  ;;  %v1113_v54 = vpop.f32.mrf.mxu0  ;;  %v1129_v55 = vpop.f32.mrf.mxu1  ;;  %v581_v58 = vmax.f32 %v497_v46, 0.0  ;;  %v597_v59 = vmax.f32 %v561_v47, 0.0 }
 0x146   : > { %1046 = vst [vmem:[%s1553_s28 + $0x20] sm:$0xff] %v986_v50   ;;  %1054 = vst [vmem:[%s1553_s28 + $0x60] sm:$0xff] %v1026_v51   ;;  %v500_v56 = vadd.f32 %v1113_v54, %v1539_v24  ;;  %v564_v57 = vadd.f32 %v1129_v55, %v1539_v24  ;;  %v579_v2 = vmax.f32 %v489_v52, 0.0 }
 0x147   : > { %v491_v60 = vpop.f32.mrf.mxu0  ;;  %v555_v61 = vpop.f32.mrf.mxu1  ;;  %v595_v3 = vmax.f32 %v553_v53, 0.0 }
 0x148   : > { %v582_v62 = vmax.f32 %v500_v56, 0.0  ;;  %v598_v63 = vmax.f32 %v564_v57, 0.0  ;;  %v492_v0 = vadd.f32 %v1539_v24, %v491_v60  ;;  %v556_v1 = vadd.f32 %v1539_v24, %v555_v61 }
 0x14a   : > { %v1001_v4 = vpack.c.bf16 %v582_v62, %v581_v58  ;;  %v1041_v5 = vpack.c.bf16 %v598_v63, %v597_v59  ;;  %v580_v6 = vmax.f32 %v492_v0, 0.0  ;;  %v596_v7 = vmax.f32 %v556_v1, 0.0 }
 0x14c   : > { %1049 = vst [vmem:[%s1553_s28 + $0x38] sm:$0xff] %v1001_v4   ;;  %1057 = vst [vmem:[%s1553_s28 + $0x78] sm:$0xff] %v1041_v5   ;;  %v996_v24 = vpack.c.bf16 %v580_v6, %v579_v2  ;;  %v1036_v8 = vpack.c.bf16 %v596_v7, %v595_v3 }
 0x14e   : > { %1048 = vst [vmem:[%s1553_s28 + $0x30] sm:$0xff] %v996_v24   ;;  %1056 = vst [vmem:[%s1553_s28 + $0x70] sm:$0xff] %v1036_v8  }
 0x14f   : > { %1298 = shalt.err (!%p1295_p0)
}
 0x150   : > { %s1299_s11 = scalar_lea.hbm %s1594_s4, 2048  ;;  %s1303_s30 = scalar_lea.hbm %s1646_s3, 4096 }
 0x151   : > { %p1300_p5 = scmp.ne.s32.totalorder %s1594_s4, %s1299_s11  ;;  %p1304_p4 = scmp.lt.s32.totalorder %s1594_s4, %s1646_s3 }
 0x152   : > { %p1305_p6 = scmp.lt.s32.totalorder %s1303_s30, %s1299_s11 }
 0x153   : > { %p1301_p2 = pnand %p1300_p5, %p1662_p11 }
 0x154   : > { %p1306_p8 = por %p1305_p6, %p1304_p4 }
 0x155   : > { %p1302_p1 = pneg %p1301_p2 }
 0x157   : > { %p1307_p3 = pnand %p1306_p8, %p1302_p1 }
 0x159   : > { %1310 = shalt.err (!%p1307_p3)
}
 0x15a   : > { %s1360_s20 = smov 64   ;;  %s1361_s28 = smov 4  }
 0x15b   : > { %1152 = dma.vmem_to_hbm [thread:$0]  (%p1662_p11), %s1596_s17, 2048, %s1594_s4, %s760_s16, %s1360_s20, %s1360_s20, %s1361_s28  }
 0x15c PF: > { %s788_s29 = sand.u32 1, %s1341_s12   ;;  %p1663_p7 = scmp.ne.s32.totalorder %s1652_s19, 0 }
 0x15d   : > { %p1664_p9 = scmp.ge.s32.totalorder %s1353_s15, 2  ;;  %s789_s22 = scalar_lea.sflag [#allocation4], %s788_s29 }
 0x15f   : > { %p1163_p10 = pnand %p1664_p9, %p1663_p7 }
 0x161   : > { %p1164_p12 = pneg %p1163_p10 }
 0x163   : > { %1336 = dma.done.wait (%p1164_p12), %s789_s22, 2048  }
 0x164   : > { %1338 = vsyncadd (%p1164_p12), %s789_s22, 4294965248  ;;  %p17_p13 = scmp.ge.s32.totalorder %s1436_s24, 4   ;;  %s1665_s12 = smov %s1345_s13 }
 0x165   : > { %s1666_s13 = smov %s1349_s14  ;;  %s1667_s14 = smov %s1456_s5 }
 0x166   : > { %s1668_s15 = smov %s1436_s24  ;;  %19 = sbr.rel (!%p17_p13) target bundleno = 6 (0x6), region = 81 }
 0x16b   :  { %794 = vsyncpa [#allocation3], 1 }
 0x16c   :  { %796 = vsyncpa [#allocation3 + $0x1], 1 }
 0x16d   :  { %797 = vsyncpa [#allocation6], 1 }
 0x16e   :  { %798 = vsyncpa [#allocation4], 1 }
 0x16f   :  { %800 = vsyncpa [#allocation4 + $0x1], 1 }

</bundles_post_ra>
